<compile_context>
chip_gen: v7x
topology: tpu7x:2x2x1
jax: 0.10.0
libtpu: 0.0.40
codegen_flags: <defaults>
</compile_context>

<pallas_src>
import functools

import jax
import jax.numpy as jnp
from jax.experimental import pallas as pl
from jax.experimental.pallas import tpu as pltpu


def _pam_kernel(C, C8p, CV, TQ, HW, HW_pad,
                x_ref, w_ref, b_ref, gamma_ref, o_ref,
                q_sc, k_sc, v_sc):
    # x_ref   : (C, HW_pad) bf16  -- per-batch slab, resident across query tiles
    # w_ref   : (NP, C)     bf16  -- stacked [Wq;0pad;Wk;0pad;Wv;zeros], NP=2*C8p+CV
    # b_ref   : (NP, 1)     f32   -- stacked biases (+1.0 for the denominator row)
    # gamma   : (1, 1)      f32   (SMEM)
    # o_ref   : (C, TQ)     f32
    # q_sc/k_sc: (C8p, HW_pad) bf16; v_sc: (CV, HW_pad) bf16 (last row -> denom)
    qi = pl.program_id(1)

    # ---- once per batch: fused, chunked q/k/v projection into VMEM scratch
    @pl.when(qi == 0)
    def _():
        w = w_ref[...]                                    # (NP, C) bf16
        b = b_ref[...]                                    # (NP, 1) f32
        n_chunks = HW_pad // TQ

        @pl.loop(0, n_chunks)
        def _(ci):
            off = pl.multiple_of(ci * TQ, TQ)
            xc = x_ref[:, pl.ds(off, TQ)]                 # (C, TQ) bf16
            proj = (jnp.dot(w, xc, preferred_element_type=jnp.float32)
                    + b).astype(jnp.bfloat16)             # (NP, TQ)
            q_sc[:, pl.ds(off, TQ)] = proj[0:C8p]
            k_sc[:, pl.ds(off, TQ)] = proj[C8p:2 * C8p]
            v_sc[:, pl.ds(off, TQ)] = proj[2 * C8p:]      # value rows + ones row

    # ---- per query tile attention
    start = pl.multiple_of(qi * TQ, TQ)
    q_t = q_sc[:, pl.ds(start, TQ)]                       # (C8p, TQ) bf16

    # energy[i, j] = sum_c q[c, i] * k[c, j]  (bf16 MXU operands, f32 accumulate)
    energy = jax.lax.dot_general(
        q_t, k_sc[...], (((0,), (0,)), ((), ())),
        preferred_element_type=jnp.float32)                # (TQ, HW_pad) f32

    if HW_pad != HW:                                       # static: mask padded keys
        key_idx = jax.lax.broadcasted_iota(jnp.int32, (TQ, HW_pad), 1)
        energy = jnp.where(key_idx < HW, energy, -1e30)

    # numerically stable softmax numerator; normalization deferred past the matmul
    m = jnp.max(energy, axis=-1, keepdims=True)            # (TQ, 1)
    p = jnp.exp(energy - m).astype(jnp.bfloat16)           # (TQ, HW_pad) unnormalized

    # out_ext[c, i] = sum_j v_ext[c, j] * p[i, j]; the last (all-ones) row of
    # v_ext yields the softmax denominator, already laid out along lanes.
    out_ext = jax.lax.dot_general(
        v_sc[...], p, (((1,), (1,)), ((), ())),
        preferred_element_type=jnp.float32)                 # (CV, TQ) f32

    scale = gamma_ref[0, 0] * pl.reciprocal(out_ext[C:C + 1], approx=True)  # (1, TQ)
    res = x_ref[:, pl.ds(start, TQ)].astype(jnp.float32)    # residual tile (C, TQ)
    o_ref[...] = (out_ext[0:C] * scale + res).astype(o_ref.dtype)


def _round_up(x, m):
    return (x + m - 1) // m * m


def _pick_tiling(C, C8p, CV, HW_pad, tq_req):
    """Pick a query-tile size and VMEM limit from the device's VMEM capacity."""
    try:
        vmem_phys = int(pltpu.get_tpu_info().vmem_capacity_bytes)
    except Exception:
        vmem_phys = 64 * 1024 * 1024               # v7x-safe fallback
    budget = int(vmem_phys * 0.75)
    NP = 2 * C8p + CV
    # resident bytes: bf16 q/k/v scratch + double-buffered bf16 x slab + weights
    fixed = ((2 * C8p + CV) * HW_pad * 2
             + 2 * C * HW_pad * 2
             + NP * (C * 2 + 4))
    cands = [t for t in (1024, 512, 256, 128) if HW_pad % t == 0]
    if tq_req is not None and HW_pad % tq_req == 0:
        cands = [tq_req]
    tq = cands[-1] if cands else 128
    for t in cands:
        per_tile = (10 * t * HW_pad                # energy f32 + exp f32 + bf16 p
                    + NP * t * 6                   # chunked projection temporaries
                    + (CV + 2 * C) * t * 4)        # out_ext + double-buffered out tile
        if fixed + per_tile <= budget:
            tq = t
            break
    vmem_limit = max(32 * 1024 * 1024, int(vmem_phys * 0.8))
    return tq, vmem_limit


def pam_forward(x, wq, bq, wk, bk, wv, bv, gamma, *, tq=None):
    """PAM forward.  x: (B, C, H, W); wq/wk: (C//8, C); wv: (C, C); 1-D biases;
    gamma: shape (1,).  Returns (B, C, H, W) in x.dtype."""
    B, C, H, W = x.shape
    HW = H * W
    HW_pad = _round_up(HW, 128)
    C8 = wq.shape[0]
    C8p = max(16, _round_up(C8, 16))      # sublane-aligned q/k row count (bf16)
    CV = C + 1                            # value rows + all-ones denominator row
    NP = 2 * C8p + CV

    tq, vmem_limit = _pick_tiling(C, C8p, CV, HW_pad, tq)
    n_q = HW_pad // tq

    # single pass over x: flatten, cast to bf16, zero-pad the spatial axis.
    x_bf = x.reshape(B, C, HW).astype(jnp.bfloat16)
    if HW_pad != HW:
        x_bf = jnp.pad(x_bf, ((0, 0), (0, 0), (0, HW_pad - HW)))

    f32 = jnp.float32

    def _pad_rows(w, rows):
        w = jnp.asarray(w, f32)
        if rows > w.shape[0]:
            w = jnp.concatenate(
                [w, jnp.zeros((rows - w.shape[0], w.shape[1]), f32)], axis=0)
        return w

    def _pad_vec(b, rows):
        b = jnp.asarray(b, f32)
        if rows > b.shape[0]:
            b = jnp.concatenate([b, jnp.zeros((rows - b.shape[0],), f32)], axis=0)
        return b

    # stacked projection weights: [Wq; 0pad; Wk; 0pad; Wv; zeros-row(denominator)]
    w_stack = jnp.concatenate(
        [_pad_rows(wq, C8p), _pad_rows(wk, C8p), jnp.asarray(wv, f32),
         jnp.zeros((1, C), f32)], axis=0).astype(jnp.bfloat16)          # (NP, C)
    # stacked biases; the denominator row gets bias 1.0 so its projection == 1.
    b_stack = jnp.concatenate(
        [_pad_vec(bq, C8p), _pad_vec(bk, C8p), jnp.asarray(bv, f32),
         jnp.ones((1,), f32)], axis=0).reshape(NP, 1)                   # (NP, 1) f32
    gamma2 = jnp.asarray(gamma, f32).reshape(1, 1)

    kernel = functools.partial(_pam_kernel, C, C8p, CV, tq, HW, HW_pad)

    out_pad = pl.pallas_call(
        kernel,
        out_shape=jax.ShapeDtypeStruct((B, C, HW_pad), jnp.float32),
        grid_spec=pltpu.PrefetchScalarGridSpec(
            num_scalar_prefetch=0,
            grid=(B, n_q),
            in_specs=[
                # bf16 x slab: resident across the query-tile axis (batch squeezed)
                pl.BlockSpec((None, C, HW_pad), lambda b, q: (b, 0, 0)),
                # fused projection weights / biases (tiny, full blocks)
                pl.BlockSpec((NP, C), lambda b, q: (0, 0)),
                pl.BlockSpec((NP, 1), lambda b, q: (0, 0)),
                # gamma scalar
                pl.BlockSpec(memory_space=pltpu.SMEM),
            ],
            out_specs=pl.BlockSpec((None, C, tq), lambda b, q: (b, 0, q)),
            scratch_shapes=[
                pltpu.VMEM((C8p, HW_pad), jnp.bfloat16),   # q (all positions)
                pltpu.VMEM((C8p, HW_pad), jnp.bfloat16),   # k
                pltpu.VMEM((CV, HW_pad), jnp.bfloat16),    # v (+ ones row)
            ],
        ),
        compiler_params=pltpu.CompilerParams(
            dimension_semantics=("parallel", "arbitrary"),
            vmem_limit_bytes=vmem_limit),
    )(x_bf, w_stack, b_stack, gamma2)

    out = out_pad[:, :, :HW] if HW_pad != HW else out_pad
    return out.reshape(B, C, H, W).astype(x.dtype)


def pam_reference(x, wq, bq, wk, bk, wv, bv, gamma):
    """Pure-JAX f32 reference mirroring the PyTorch forward."""
    B, C, H, W = x.shape
    HW = H * W
    xf = x.reshape(B, C, HW)
    q = jnp.einsum('oc,bch->boh', wq, xf) + bq[None, :, None]    # (B, C//8, HW)
    k = jnp.einsum('oc,bch->boh', wk, xf) + bk[None, :, None]
    v = jnp.einsum('oc,bch->boh', wv, xf) + bv[None, :, None]
    energy = jnp.einsum('bci,bcj->bij', q, k)                    # (B, HW, HW)
    att = jax.nn.softmax(energy, axis=-1)
    out = jnp.einsum('bcj,bij->bci', v, att)                     # (B, C, HW)
    return (gamma[0] * out + xf).reshape(B, C, H, W)


if __name__ == "__main__":
    def _run_case(case_key, B, C, H, W, tq):
        C8 = C // 8
        kx, kwq, kbq, kwk, kbk, kwv, kbv = jax.random.split(case_key, 7)
        x = jax.random.normal(kx, (B, C, H, W), dtype=jnp.float32)
        # 1x1 conv weights squeezed to 2D matrices, 1-D biases (as in Conv2d).
        wq = 0.1 * jax.random.normal(kwq, (C8, C), dtype=jnp.float32)
        bq = 0.1 * jax.random.normal(kbq, (C8,), dtype=jnp.float32)
        wk = 0.1 * jax.random.normal(kwk, (C8, C), dtype=jnp.float32)
        bk = 0.1 * jax.random.normal(kbk, (C8,), dtype=jnp.float32)
        wv = 0.1 * jax.random.normal(kwv, (C, C), dtype=jnp.float32)
        bv = 0.1 * jax.random.normal(kbv, (C,), dtype=jnp.float32)
        # Module inits gamma to 0; use a nonzero value so attention is exercised.
        gamma = jnp.full((1,), 0.5, dtype=jnp.float32)

        out = jax.block_until_ready(
            pam_forward(x, wq, bq, wk, bk, wv, bv, gamma, tq=tq))
        ref = pam_reference(x, wq, bq, wk, bk, wv, bv, gamma)
        assert out.shape == (B, C, H, W)
        # bf16 MXU operands / bf16 x slab (f32 accumulation) -> loosened tolerance.
        err = float(jnp.max(jnp.abs(out - ref)))
        assert err < 5e-2, (
            f"mismatch vs reference (B={B},C={C},H={H},W={W}): max abs err = {err}")

    key = jax.random.PRNGKey(0)
    k1, k2 = jax.random.split(key)
    # multi-query-tile (flash-style) path: HW = 256, TQ = 128.
    _run_case(k1, B=2, C=32, H=16, W=16, tq=128)
    # padded / masked path: HW = 100 -> padded to 128, single tile.
    _run_case(k2, B=1, C=16, H=10, W=10, tq=None)

    print("KERNEL_OK")
</pallas_src>

<mosaic_0001>
module attributes {stable_mosaic.version = 11 : i64} {
  func.func @_pam_kernel(%arg0: i32, %arg1: i32, %arg2: memref<1x32x256xbf16, #tpu.memory_space<vmem>>, %arg3: memref<65x32xbf16, #tpu.memory_space<vmem>>, %arg4: memref<65x1xf32, #tpu.memory_space<vmem>>, %arg5: memref<1x1xf32, #tpu.memory_space<smem>>, %arg6: memref<1x32x128xf32, #tpu.memory_space<vmem>>, %arg7: memref<16x256xbf16, #tpu.memory_space<vmem>>, %arg8: memref<16x256xbf16, #tpu.memory_space<vmem>>, %arg9: memref<33x256xbf16, #tpu.memory_space<vmem>>) attributes {dimension_semantics = [#tpu.dimension_semantics<parallel>, #tpu.dimension_semantics<arbitrary>], iteration_bounds = array<i64: 2, 2>, scalar_prefetch = 0 : i64, scratch_operands = 3 : i64, tpu.core_type = #tpu.core_type<tc>, window_params = [{transform_indices = @transform_0, window_bounds = array<i64: 1, 32, 256>}, {pipeline_mode = #tpu.pipeline_mode<synchronous>, transform_indices = @transform_1, window_bounds = array<i64: 65, 32>}, {pipeline_mode = #tpu.pipeline_mode<synchronous>, transform_indices = @transform_2, window_bounds = array<i64: 65, 1>}, {transform_indices = @transform_3, window_bounds = array<i64: 1, 1>}, {transform_indices = @transform_4, window_bounds = array<i64: 1, 32, 128>}]} {
    %c0_i32 = arith.constant 0 : i32
    %0 = arith.cmpi eq, %arg1, %c0_i32 : i32
    %1 = arith.extui %0 : i1 to i32
    %c0_i32_0 = arith.constant 0 : i32
    %2 = arith.cmpi ne, %1, %c0_i32_0 : i32
    scf.if %2 {
      %c0_14 = arith.constant 0 : index
      %c0_15 = arith.constant 0 : index
      %33 = vector.load %arg3[%c0_14, %c0_15] : memref<65x32xbf16, #tpu.memory_space<vmem>>, vector<65x32xbf16>
      %c0_16 = arith.constant 0 : index
      %c0_17 = arith.constant 0 : index
      %34 = vector.load %arg4[%c0_16, %c0_17] : memref<65x1xf32, #tpu.memory_space<vmem>>, vector<65x1xf32>
      %c0_i32_18 = arith.constant 0 : i32
      %c2_i32 = arith.constant 2 : i32
      %35 = arith.addi %c0_i32_18, %c2_i32 : i32
      %c1_i32 = arith.constant 1 : i32
      scf.for %arg10 = %c0_i32_18 to %35 step %c1_i32  : i32 {
        %c1_i32_20 = arith.constant 1 : i32
        %36 = arith.muli %arg10, %c1_i32_20 : i32
        %c0_i32_21 = arith.constant 0 : i32
        %37 = arith.addi %c0_i32_21, %36 : i32
        %c128_i32_22 = arith.constant 128 : i32
        %38 = arith.muli %37, %c128_i32_22 : i32
        %39 = tpu.assume_multiple %38, 128 : i32
        %c0_23 = arith.constant 0 : index
        %c0_24 = arith.constant 0 : index
        %40 = arith.index_cast %39 : i32 to index
        %41 = vector.load %arg2[%c0_23, %c0_24, %40] : memref<1x32x256xbf16, #tpu.memory_space<vmem>>, vector<1x32x128xbf16>
        %42 = vector.shape_cast %41 : vector<1x32x128xbf16> to vector<32x128xbf16>
        %cst_25 = arith.constant dense<0.000000e+00> : vector<65x128xf32>
        %43 = tpu.matmul %33, %42, %cst_25 {dimension_numbers = #tpu.dot_dimension_numbers<[1], [0], [0], [1], [0, 0, 1, 1], [], []>} : vector<65x32xbf16>, vector<32x128xbf16>, vector<65x128xf32> -> vector<65x128xf32>
        %44 = vector.broadcast %34 : vector<65x1xf32> to vector<65x128xf32>
        %45 = arith.addf %43, %44 : vector<65x128xf32>
        %46 = arith.truncf %45 : vector<65x128xf32> to vector<65x128xbf16>
        %47 = vector.extract_strided_slice %46 {offsets = [0, 0], sizes = [16, 128], strides = [1, 1]} : vector<65x128xbf16> to vector<16x128xbf16>
        %c0_26 = arith.constant 0 : index
        %48 = arith.index_cast %39 : i32 to index
        %49 = vector.load %arg7[%c0_26, %48] : memref<16x256xbf16, #tpu.memory_space<vmem>>, vector<16x128xbf16>
        tpu.vector_store %arg7[%c0_26, %48], %47 {strides = array<i32>} : memref<16x256xbf16, #tpu.memory_space<vmem>>, vector<16x128xbf16>,
        %50 = vector.extract_strided_slice %46 {offsets = [16, 0], sizes = [16, 128], strides = [1, 1]} : vector<65x128xbf16> to vector<16x128xbf16>
        %c0_27 = arith.constant 0 : index
        %51 = arith.index_cast %39 : i32 to index
        %52 = vector.load %arg8[%c0_27, %51] : memref<16x256xbf16, #tpu.memory_space<vmem>>, vector<16x128xbf16>
        tpu.vector_store %arg8[%c0_27, %51], %50 {strides = array<i32>} : memref<16x256xbf16, #tpu.memory_space<vmem>>, vector<16x128xbf16>,
        %53 = vector.extract_strided_slice %46 {offsets = [32, 0], sizes = [33, 128], strides = [1, 1]} : vector<65x128xbf16> to vector<33x128xbf16>
        %c0_28 = arith.constant 0 : index
        %54 = arith.index_cast %39 : i32 to index
        %55 = vector.load %arg9[%c0_28, %54] : memref<33x256xbf16, #tpu.memory_space<vmem>>, vector<33x128xbf16>
        tpu.vector_store %arg9[%c0_28, %54], %53 {strides = array<i32>} : memref<33x256xbf16, #tpu.memory_space<vmem>>, vector<33x128xbf16>,
      }
      %c2_i32_19 = arith.constant 2 : i32
    } else {
    }
    %c128_i32 = arith.constant 128 : i32
    %3 = arith.muli %arg1, %c128_i32 : i32
    %4 = tpu.assume_multiple %3, 128 : i32
    %c0 = arith.constant 0 : index
    %5 = arith.index_cast %4 : i32 to index
    %6 = vector.load %arg7[%c0, %5] : memref<16x256xbf16, #tpu.memory_space<vmem>>, vector<16x128xbf16>
    %c0_1 = arith.constant 0 : index
    %c0_2 = arith.constant 0 : index
    %7 = vector.load %arg8[%c0_1, %c0_2] : memref<16x256xbf16, #tpu.memory_space<vmem>>, vector<16x256xbf16>
    %cst = arith.constant dense<0.000000e+00> : vector<128x256xf32>
    %8 = tpu.matmul %6, %7, %cst {dimension_numbers = #tpu.dot_dimension_numbers<[0], [0], [1], [1], [0, 1, 1, 1], [], []>} : vector<16x128xbf16>, vector<16x256xbf16>, vector<128x256xf32> -> vector<128x256xf32>
    %cst_3 = arith.constant dense<0xFF800000> : vector<128xf32>
    %9 = vector.multi_reduction <maximumf>, %8, %cst_3 [1] : vector<128x256xf32> to vector<128xf32>
    %10 = vector.shape_cast %9 : vector<128xf32> to vector<128x1xf32>
    %11 = vector.broadcast %10 : vector<128x1xf32> to vector<128x256xf32>
    %12 = arith.subf %8, %11 : vector<128x256xf32>
    %13 = math.exp %12 : vector<128x256xf32>
    %14 = arith.truncf %13 : vector<128x256xf32> to vector<128x256xbf16>
    %c0_4 = arith.constant 0 : index
    %c0_5 = arith.constant 0 : index
    %15 = vector.load %arg9[%c0_4, %c0_5] : memref<33x256xbf16, #tpu.memory_space<vmem>>, vector<33x256xbf16>
    %cst_6 = arith.constant dense<0.000000e+00> : vector<33x128xf32>
    %16 = tpu.matmul %15, %14, %cst_6 {dimension_numbers = #tpu.dot_dimension_numbers<[1], [1], [0], [0], [0, 0, 1, 0], [], []>} : vector<33x256xbf16>, vector<128x256xbf16>, vector<33x128xf32> -> vector<33x128xf32>
    %c0_7 = arith.constant 0 : index
    %c0_8 = arith.constant 0 : index
    %17 = memref.load %arg5[%c0_7, %c0_8] : memref<1x1xf32, #tpu.memory_space<smem>>
    %18 = vector.extract_strided_slice %16 {offsets = [32, 0], sizes = [1, 128], strides = [1, 1]} : vector<33x128xf32> to vector<1x128xf32>
    %19 = tpu.reciprocal %18 {approx = true} : vector<1x128xf32> -> vector<1x128xf32>
    %20 = vector.broadcast %17 : f32 to vector<1x128xf32>
    %21 = arith.mulf %20, %19 : vector<1x128xf32>
    %c0_9 = arith.constant 0 : index
    %c0_10 = arith.constant 0 : index
    %22 = arith.index_cast %4 : i32 to index
    %23 = vector.load %arg2[%c0_9, %c0_10, %22] : memref<1x32x256xbf16, #tpu.memory_space<vmem>>, vector<1x32x128xbf16>
    %24 = vector.shape_cast %23 : vector<1x32x128xbf16> to vector<32x128xbf16>
    %25 = arith.extf %24 : vector<32x128xbf16> to vector<32x128xf32>
    %26 = vector.extract_strided_slice %16 {offsets = [0, 0], sizes = [32, 128], strides = [1, 1]} : vector<33x128xf32> to vector<32x128xf32>
    %27 = vector.broadcast %21 : vector<1x128xf32> to vector<32x128xf32>
    %28 = arith.mulf %26, %27 : vector<32x128xf32>
    %29 = arith.addf %28, %25 : vector<32x128xf32>
    %c0_11 = arith.constant 0 : index
    %c0_12 = arith.constant 0 : index
    %c0_13 = arith.constant 0 : index
    %30 = vector.load %arg6[%c0_11, %c0_12, %c0_13] : memref<1x32x128xf32, #tpu.memory_space<vmem>>, vector<1x32x128xf32>
    %31 = vector.shape_cast %30 : vector<1x32x128xf32> to vector<32x128xf32>
    %32 = vector.shape_cast %29 : vector<32x128xf32> to vector<1x32x128xf32>
    tpu.vector_store %arg6[%c0_11, %c0_12, %c0_13], %32 {strides = array<i32>} : memref<1x32x128xf32, #tpu.memory_space<vmem>>, vector<1x32x128xf32>,
    return
  }
  func.func @transform_0(%arg0: i32, %arg1: i32) -> (i32, i32, i32) {
    %c0_i32 = arith.constant 0 : i32
    %c0_i32_0 = arith.constant 0 : i32
    %c0_i32_1 = arith.constant 0 : i32
    return %arg0, %c0_i32, %c0_i32_0 : i32, i32, i32
  }
  func.func @transform_1(%arg0: i32, %arg1: i32) -> (i32, i32) {
    %c0_i32 = arith.constant 0 : i32
    %c0_i32_0 = arith.constant 0 : i32
    %c0_i32_1 = arith.constant 0 : i32
    return %c0_i32, %c0_i32_0 : i32, i32
  }
  func.func @transform_2(%arg0: i32, %arg1: i32) -> (i32, i32) {
    %c0_i32 = arith.constant 0 : i32
    %c0_i32_0 = arith.constant 0 : i32
    %c0_i32_1 = arith.constant 0 : i32
    return %c0_i32, %c0_i32_0 : i32, i32
  }
  func.func @transform_3(%arg0: i32, %arg1: i32) -> (i32, i32) {
    %c0_i32 = arith.constant 0 : i32
    %c0_i32_0 = arith.constant 0 : i32
    %c0_i32_1 = arith.constant 0 : i32
    return %c0_i32, %c0_i32_0 : i32, i32
  }
  func.func @transform_4(%arg0: i32, %arg1: i32) -> (i32, i32, i32) {
    %c0_i32 = arith.constant 0 : i32
    %c0_i32_0 = arith.constant 0 : i32
    return %arg0, %c0_i32, %arg1 : i32, i32, i32
  }
}

</mosaic_0001>

<bundles_post_ra>
// kernel: tpu_custom_call.1
= control target key start
LH: loop header
LB: loop body
LE: loop exit
PB: predicated region body
PF: predicated region fallthrough
CT: control target
= control target key end

     0   :  { %s1862_s0 = inlined_call_operand.vmem [shape: bf16[2,32,256], index: 0, kind: input, shape index: {}]   ;;  %s1863_s1 = inlined_call_operand.vmem [shape: bf16[65,32], index: 1, kind: input, shape index: {}]   ;;  %s1864_s2 = inlined_call_operand.vmem [shape: f32[65,1], index: 2, kind: input, shape index: {}]   ;;  %s1865_s3 = inlined_call_operand.<no memory space> [shape: f32[1,1], index: 3, kind: input, shape index: {}]   ;;  %s1866_s4 = inlined_call_operand.hbm [shape: f32[2,32,256], index: 4, kind: output, shape index: {}]  }
   0x1   :  { %9 = sst [smem:[#allocation5]] %s1865_s3 }
   0x2   :  { %10 = vsyncpa [#allocation7], 0 }
   0x3   :  { %12 = vsyncpa [#allocation7 + $0x1], 0  ;;  %s1419_s17 = smov 0   ;;  %s1421_s18 = smov 0  }
   0x4   :  { %s1423_s19 = smov 0   ;;  %s1425_s20 = smov 0  }
   0x5   :  { %s1427_s21 = smov 0   ;;  %s1429_s22 = smov 0  }
   0x6   :  { %s1431_s23 = smov 0   ;;  %s1433_s24 = smov 0  }
   0x7 LB: > { %s1005_s3 = sadd.s32 4294967295, %s1377_s24   ;;  %s1006_s25 = sadd.s32 4294967294, %s1377_s24   ;;  %s1377_s24 = sphi %s1433_s24, %s18_s24   ;;  %s1373_s23 = sphi %s1431_s23, %s1875_s23   ;;  %s1369_s22 = sphi %s1429_s22, %s1874_s22   ;;  %s1365_s21 = sphi %s1427_s21, %s1873_s21   ;;  %s1361_s20 = sphi %s1425_s20, %s1872_s20   ;;  %s1357_s19 = sphi %s1423_s19, %s1871_s19   ;;  %s1353_s18 = sphi %s1421_s18, %s1870_s18   ;;  %s1349_s17 = sphi %s1419_s17, %s1869_s17  }
   0x8   : > { %s27_s26 = sadd.s32 1, %s1369_s22  ;;  %s30_s27 = sadd.s32 1, %s1373_s23 }
   0x9   : > { %p28_p0 = scmp.ge.s32.totalorder %s27_s26, 2  ;;  %p138_p1 = scmp.ne.s32.totalorder %s1357_s19, %s1353_s18 }
   0xa   : > { %p139_p2 = scmp.eq.s32.totalorder %s1005_s3, 3  ;;  %p144_p5 = scmp.ne.s32.totalorder %s1353_s18, %s1349_s17 }
   0xb   : > { %s1877_s26 = smov (%p28_p0, %s27_s26), 0  ;;  %s1879_s27 = smov (!%p28_p0, %s30_s27), %s1373_s23 }
   0xc   : > { %s124_s28 = ssub.s32 %s1369_s22, %s1877_s26  ;;  %p1470_p3 = por %p139_p2, %p138_p1 }
   0xd   : > { %p32_p4 = scmp.ge.s32.totalorder %s1879_s27, 2  ;;  %p145_p6 = scmp.eq.s32.totalorder %s1006_s25, 3 }
   0xe   : > { %p1009_p7 = scmp.ge.s32.totalorder %s1377_s24, 1  ;;  %p180_p9 = scmp.lt.s32.totalorder %s1377_s24, 5 }
   0xf   : > { %s1881_s27 = smov (%p32_p4, %s1879_s27), 0  ;;  %p1479_p8 = por %p145_p6, %p144_p5 }
  0x10   : > { %s123_s5 = ssub.s32 %s1373_s23, %s1881_s27  ;;  %s128_s6 = sadd.s32 1, %s1357_s19 }
  0x11   : > { %s125_s7 = sor.u32 %s124_s28, %s123_s5  ;;  %p181_p10 = pnand %p1009_p7, %p180_p9 }
  0x12   : > { %p126_p11 = scmp.eq.s32.totalorder %s125_s7, 0  ;;  %s203_s9 = sand.u32 (!%p181_p10), 1, %s1353_s18  }
  0x13   : > { %184 = sbr.rel (%p181_p10) target bundleno = 1089 (0x441), region = 36  ;;  %p206_p12 = scmp.lt.s32.totalorder (!%p181_p10), %s1365_s21, 1 }
  0x14   : > { %s1488_s8 = scalar_select %p126_p11, %s1357_s19, %s128_s6  }
  0x15   : > { %s1010_s10 = sshll.u32 (!%p181_p10), %s203_s9, 5  ;;  %p1013_p13 = scmp.ne.s32.totalorder (!%p181_p10), %s1361_s20, 0 }
  0x16   : > { %s1500_s16 = scalar_lea.vmem (!%p181_p10), [#allocation6], %s1010_s10 }
  0x1a   : > { %s207_s11 = scalar_select %p206_p12, %s1365_s21, 1 }
  0x1b   : > { %215 = sbr.rel (%p1013_p13) target bundleno = 282 (0x11a), region = 40  ;;  %v1506_v0 = vld [vmem:[%s1863_s1] sm:$0xf] (!%p1013_p13)  ;;  %v1511_v1 = vld [vmem:[%s1863_s1 + $0x4] sm:$0xf] (!%p1013_p13)  ;;  %v1556_v10 = vld [vmem:[%s1864_s2 + $0x8] sm:$0xff] (!%p1013_p13) }
  0x1c   : > { %s1058_s12 = sshll.u32 %s207_s11, 5  ;;  %v1516_v2 = vld [vmem:[%s1863_s1 + $0x8] sm:$0xf] (!%p1013_p13)  ;;  %v1521_v3 = vld [vmem:[%s1863_s1 + $0xc] sm:$0xf] (!%p1013_p13)  ;;  %v1551_v9 = vld [vmem:[%s1864_s2] sm:$0xff] (!%p1013_p13) }
  0x1d   : > { %s1498_s15 = scalar_lea.vmem %s1862_s0, %s1058_s12  ;;  %v1526_v4 = vld [vmem:[%s1863_s1 + $0x10] sm:$0xf] (!%p1013_p13)  ;;  %v1531_v5 = vld [vmem:[%s1863_s1 + $0x14] sm:$0xf] (!%p1013_p13)  ;;  %v1536_v6 = vld [vmem:[%s1863_s1 + $0x18] sm:$0xf] (!%p1013_p13) }
  0x1e   : > { %v1541_v7 = vld [vmem:[%s1863_s1 + $0x1c] sm:$0xf] (!%p1013_p13)  ;;  %v1546_v8 = vld [vmem:[%s1863_s1 + $0x20] sm:$0x1] (!%p1013_p13)  ;;  %v1561_v11 = vld [vmem:[%s1864_s2 + $0x10] sm:$0xff] (!%p1013_p13)  ;;  %s1593_s5 = smov (!%p1013_p13), 0  }
  0x1f   : > { %v1566_v12 = vld [vmem:[%s1864_s2 + $0x18] sm:$0xff] (!%p1013_p13)  ;;  %v1571_v13 = vld [vmem:[%s1864_s2 + $0x20] sm:$0xff] (!%p1013_p13)  ;;  %v1576_v14 = vld [vmem:[%s1864_s2 + $0x28] sm:$0xff] (!%p1013_p13) }
  0x20   : > { %v1581_v15 = vld [vmem:[%s1864_s2 + $0x30] sm:$0xff] (!%p1013_p13)  ;;  %v1586_v16 = vld [vmem:[%s1864_s2 + $0x38] sm:$0xff] (!%p1013_p13)  ;;  %v1591_v17 = vld [vmem:[%s1864_s2 + $0x40] sm:$0x1] (!%p1013_p13) }
  0x22 LB: >> { %v1383_v18 = vmov 0.0   ;;  %s1014_s6 = sshll.u32 %s1381_s5, 7  ;;  %vm1384_vm0 = vmmov 0   ;;  %v1385_v19 = vmov 0   ;;  %v1016_v22 = vcombine.low %v1506_v0, %v1511_v1  ;;  %s239_s5 = sadd.s32 1, %s1381_s5   ;;  %s1381_s5 = sphi %s1593_s5, %s239_s5  }
  0x23   : >> { %1071 = vmatprep.subr.bf16.mxu0 %v1383_v18  ;;  %1095 = vmatprep.subr.bf16.mxu1 %v1383_v18  ;;  %s1601_s7 = sshra.s32 %s1014_s6, 7  ;;  %v1019_v23 = vcombine.low %v1536_v6, %v1541_v7  ;;  %vm329_vm1 = vcmask 261120   ;;  %v1017_v24 = vcombine.low %v1516_v2, %v1521_v3  ;;  %v1020_v25 = vcombine.low %v1546_v8, %v1546_v8  ;;  %p236_p0 = scmp.ge.s32.totalorder %s239_s5, 2  }
  0x24   : >> { %1075 = vmatprep.mubr.msk.bf16.mxu0 %vm1384_vm0, %v1383_v18  ;;  %1087 = vmatprep.mubr.msk.bf16.mxu1 %vm1384_vm0, %v1383_v18  ;;  %s1015_s10 = sshll.u32 %s1601_s7, 2  ;;  %v1018_v26 = vcombine.low %v1526_v4, %v1531_v5  ;;  %s1028_s12 = sshll.u32 %s1601_s7, 3  ;;  %vm452_vm2 = vcmask 1040384   ;;  %vm453_vm3 = vsmask.f32 256 }
  0x25   : >> { %1201 = vset.pattern.permute.xlu0 %v1385_v19  ;;  %1202 = vset.pattern.permute.xlu1 %v1385_v19  ;;  %s244_s11 = scalar_lea.vmem %s1498_s15, %s1015_s10  ;;  %s1637_s13 = scalar_lea.vmem [#allocation4], %s1015_s10  ;;  %vm454_vm4 = vmand %vm452_vm2, %vm453_vm3 }
  0x26   : >> { %291 = vperm.xlu0 %1201, %v1591_v17   ;;  %256 = vperm.xlu1 %1202, %v1556_v10   ;;  %v1203_v20 = vld [vmem:[%s244_s11] ss:$8 sps:$4 sm:$0xff]   ;;  %v1204_v21 = vld [vmem:[%s244_s11 + $0x10] ss:$8 sps:$4 sm:$0xff]   ;;  %s423_s14 = scalar_lea.vmem [#allocation2], %s1028_s12  ;;  %s426_s3 = scalar_lea.vmem [#allocation3], %s1028_s12 }
  0x27   : >> { %1072 = vmatpush3.bf16.msra.mxu0 %v1203_v20  ;;  %1097 = vmatpush3.bf16.msra.mxu1 %v1203_v20  ;;  %v455_v56 = vld [vmem:[%s1637_s13 + $0x20] sm:$0x1] }
  0x28   : >> { %1073 = vmatprep.subr.bf16.mxu0 %v1383_v18  ;;  %1096 = vmatprep.subr.bf16.mxu1 %v1383_v18 }
  0x2a   : >> { %251 = vperm.xlu0 %1201, %v1551_v9   ;;  %261 = vperm.xlu1 %1202, %v1561_v11  }
  0x2b   : >> { %1074 = vmatpush3.bf16.msra.mxu0 %v1204_v21  ;;  %1098 = vmatpush3.bf16.msra.mxu1 %v1204_v21 }
  0x2e   : >> { %266 = vperm.xlu0 %1201, %v1566_v12   ;;  %271 = vperm.xlu1 %1202, %v1571_v13  }
  0x2f   : >> { %1076 = vmatmul.mubr.msk.bf16.vlgmr.msra.gmra.mrb[0].mxu0 %vm329_vm1, %v1016_v22  ;;  %1088 = vmatmul.mubr.msk.bf16.vlgmr.msra.gmra.mrb[0].mxu1 %vm329_vm1, %v1019_v23 }
  0x30   : >> { %1079 = vmatprep.mubr.msk.bf16.mxu0 %vm1384_vm0, %v1383_v18  ;;  %1091 = vmatprep.mubr.msk.bf16.mxu1 %vm1384_vm0, %v1383_v18 }
  0x32   : >> { %276 = vperm.xlu0 %1201, %v1576_v14   ;;  %281 = vperm.xlu1 %1202, %v1581_v15  }
  0x36   : >> { %286 = vperm.xlu0 %1201, %v1586_v16  }
  0x37   : >> { %1080 = vmatmul.mubr.msk.bf16.gmra.mrb[4].mxu0 %vm329_vm1, %v1017_v24  ;;  %1092 = vmatmul.mubr.msk.bf16.gmra.mrb[4].mxu1 %vm329_vm1, %v1020_v25 }
  0x38   : >> { %1083 = vmatprep.mubr.msk.bf16.mxu0 %vm1384_vm0, %v1383_v18 }
  0x3f   : >> { %1084 = vmatmul.mubr.msk.bf16.gmra.mrb[8].mxu0 %vm329_vm1, %v1018_v26 }
  0xa5   : >> { %v292_v27 = vpop.permute.xlu0 %291  ;;  %v257_v28 = vpop.permute.xlu1 %256 }
  0xa9   : >> { %v252_v29 = vpop.permute.xlu0 %251  ;;  %v262_v30 = vpop.permute.xlu1 %261 }
  0xad   : >> { %v267_v31 = vpop.permute.xlu0 %266  ;;  %v272_v32 = vpop.permute.xlu1 %271 }
  0xb1   : >> { %v277_v33 = vpop.permute.xlu0 %276  ;;  %v282_v34 = vpop.permute.xlu1 %281 }
  0xb5   : >> { %v287_v35 = vpop.permute.xlu0 %286 }
 0x102   : >> { %v379_v36 = vpop.f32.mrb[0].mxu0  ;;  %v403_v37 = vpop.f32.mrb[0].mxu1 }
 0x103   : >> { %v1077_v38 = vpop.f32.mrb[1].mxu0  ;;  %v1089_v39 = vpop.f32.mrb[1].mxu1  ;;  %v404_v40 = vadd.f32 %v403_v37, %v282_v34  ;;  %v380_v43 = vadd.f32 %v379_v36, %v252_v29 }
 0x104   : >> { %v382_v41 = vpop.f32.mrb[2].mxu0  ;;  %v406_v42 = vpop.f32.mrb[2].mxu1 }
 0x105   : >> { %v383_v44 = vadd.f32 %v382_v41, %v257_v28  ;;  %v407_v45 = vadd.f32 %v406_v42, %v287_v35  ;;  %v1078_v46 = vpop.f32.mrb[3].mxu0  ;;  %v1061_v47 = vpack.c.bf16 %v404_v40, %v404_v40  ;;  %v1090_v48 = vpop.f32.mrb[3].mxu1 }
 0x107   : >> { %v417_v49 = vpack.c.bf16 %v383_v44, %v380_v43  ;;  %v1062_v50 = vpack.c.bf16 %v407_v45, %v407_v45  ;;  %450 = vst [vmem:[%s1637_s13 + $0x10] sm:$0xf] %v1061_v47 }
 0x109   : >> { %424 = vst [vmem:[%s423_s14] sm:$0xff] %v417_v49  ;;  %451 = vst [vmem:[%s1637_s13 + $0x18] sm:$0xf] %v1062_v50 }
 0x10a   : >> { %v387_v51 = vpop.f32.mrb[4].mxu0  ;;  %v411_v52 = vpop.f32.mrb[4].mxu1 }
 0x10b   : >> { %v412_v53 = vadd.f32 %v411_v52, %v292_v27  ;;  %v1081_v54 = vpop.f32.mrb[5].mxu0  ;;  %v1093_v55 = vpop.f32.mrb[5].mxu1  ;;  %v388_v59 = vadd.f32 %v387_v51, %v262_v30 }
 0x10c   : >> { %v390_v57 = vpop.f32.mrb[6].mxu0  ;;  %v414_v58 = vpop.f32.mrb[6].mxu1 }
 0x10d   : >> { %v1063_v60 = vpack.c.bf16 %v412_v53, %v412_v53  ;;  %v391_v61 = vadd.f32 %v390_v57, %v267_v31  ;;  %v1082_v62 = vpop.f32.mrb[7].mxu0  ;;  %v1094_v63 = vpop.f32.mrb[7].mxu1 }
 0x10f   : >> { %v456_v18 = vsel %vm454_vm4, %v1063_v60, %v455_v56  ;;  %v418_v19 = vpack.c.bf16 %v391_v61, %v388_v59 }
 0x110   : >> { %457 = vst [vmem:[%s1637_s13 + $0x20] sm:$0x1] %v456_v18 }
 0x111   : >> { %427 = vst [vmem:[%s426_s3] sm:$0xff] %v418_v19 }
 0x112   : >> { %v395_v20 = vpop.f32.mrb[8].mxu0 }
 0x113   : >> { %v396_v21 = vadd.f32 %v395_v20, %v272_v32  ;;  %v1085_v22 = vpop.f32.mrb[9].mxu0  ;;  %238 = sbr.rel (!%p236_p0) target bundleno = 34 (0x22), region = 88 }
 0x114   : >> { %v398_v23 = vpop.f32.mrb[10].mxu0 }
 0x115   : >> { %v1059_v24 = vpack.c.bf16 %v396_v21, %v396_v21  ;;  %v399_v25 = vadd.f32 %v398_v23, %v277_v33  ;;  %v1086_v26 = vpop.f32.mrb[11].mxu0 }
 0x117   : >> { %448 = vst [vmem:[%s1637_s13] sm:$0xf] %v1059_v24  ;;  %v1060_v27 = vpack.c.bf16 %v399_v25, %v399_v25 }
 0x119   : >> { %449 = vst [vmem:[%s1637_s13 + $0x8] sm:$0xf] %v1060_v27 }
 0x11a PF: > { %s1036_s25 = sshll.u32 %s1361_s20, 7  ;;  %v465_v28 = vld [vmem:[#allocation3 + $0x8] sm:$0xff]  ;;  %v464_v29 = vld [vmem:[#allocation3] sm:$0xff]  ;;  %v1386_v30 = vmov 0   ;;  %vm482_vm5 = vcmask 130048   ;;  %s868_s5 = sld [smem:[#allocation5]] }
 0x11b   : > { %s1653_s28 = sshra.s32 %s1036_s25, 7  ;;  %507 = vmatprep.subr.bf16.mxu0 %v465_v28  ;;  %539 = vmatprep.mubr.bf16.mxu0 %v1386_v30  ;;  %s1054_s12 = sshll.u32 %s1365_s21, 3 }
 0x11c   : > { %s1037_s6 = sshll.u32 %s1653_s28, 3  ;;  %508 = vmatpush1.bf16.msra.mxu0 %v464_v29  ;;  %s1052_s10 = sshll.u32 %s1653_s28, 2 }
 0x11d   : > { %s462_s7 = scalar_lea.vmem [#allocation2], %s1037_s6  ;;  %s873_s11 = scalar_lea.vmem %s1498_s15, %s1052_s10 }
 0x11e   : > { %v463_v31 = vld [vmem:[%s462_s7] sm:$0xff]  ;;  %s910_s13 = sadd.s32 %s1361_s20, %s1054_s12  ;;  %s913_s15 = sshll.u32 %s1500_s16, 4  ;;  %s1802_s15 = int_to_ptr.vmem [resolvable:$true] %s913_s15 }
 0x11f   : > { %466 = vxpose.xlu0.c.b16.start.end [1/1] (short) %v463_v31, 128  ;;  %s1055_s14 = sshll.u32 %s910_s13, 7  ;;  %s1810_s25 = scalar_lea.sflag [#allocation7], %s203_s9 }
 0x120   : > { %v1207_v24 = vld [vmem:[#allocation4 + $0x14] ss:$8 sps:$4 sm:$0xff]   ;;  %v1212_v25 = vld [vmem:[#allocation4 + $0x4] ss:$8 sps:$4 sm:$0xff]   ;;  %s1800_s3 = scalar_lea.hbm %s1866_s4, %s1055_s14  ;;  %s1279_s28 = scalar_lea.vmem %s1802_s15, 512 }
 0x121   : > { %852 = vmatprep.mubr.bf16.mxu1 %v1207_v24  ;;  %p1280_p1 = scmp.ne.s32.totalorder %s1802_s15, %s1279_s28  ;;  %s1387_s6 = smov [#allocation6]  }
 0x122   : > { %s1283_s7 = sshll.u32 %s1387_s6, 4  ;;  %s1284_s7 = int_to_ptr.vmem [resolvable:$false] %s1283_s7 }
 0x123   : > { %p1281_p2 = pnand %p1280_p1, %p1470_p3  ;;  %p1286_p5 = scmp.lt.s32.totalorder %s1802_s15, %s1284_s7 }
 0x125   : > { %p1282_p4 = pneg %p1281_p2 }
 0x185   : > { %v474_v32 = vpop.trf.xlu0 }
 0x186   : > { %1038 = vmatmul.mubr.msk.bf16.vlgmr.msra.gmra.mrb[0].mxu0 %vm482_vm5, %v474_v32 }
 0x187   : > { %549 = vmatprep.mubr.bf16.mxu0 %v1386_v30 }
 0x189   : > { %v475_v0 = vpop.trf.xlu0 }
 0x18d   : > { %v476_v1 = vpop.trf.xlu0 }
 0x18e   : > { %1039 = vmatmul.mubr.msk.bf16.gmra.mrb[4].mxu0 %vm482_vm5, %v475_v0 }
 0x18f   : > { %559 = vmatprep.mubr.bf16.mxu0 %v1386_v30 }
 0x191   : > { %v477_v2 = vpop.trf.xlu0 }
 0x195   : > { %v478_v3 = vpop.trf.xlu0 }
 0x196   : > { %1040 = vmatmul.mubr.msk.bf16.gmra.mrb[8].mxu0 %vm482_vm5, %v476_v1 }
 0x197   : > { %569 = vmatprep.mubr.bf16.mxu0 %v1386_v30 }
 0x199   : > { %v479_v4 = vpop.trf.xlu0 }
 0x19d   : > { %v480_v5 = vpop.trf.xlu0 }
 0x19e   : > { %1041 = vmatmul.mubr.msk.bf16.gmra.mrb[12].mxu0 %vm482_vm5, %v477_v2 }
 0x19f   : > { %579 = vmatprep.mubr.bf16.mxu0 %v1386_v30 }
 0x1a1   : > { %v481_v6 = vpop.trf.xlu0 }
 0x1a6   : > { %1042 = vmatmul.mubr.msk.bf16.gmra.mrb[16].mxu0 %vm482_vm5, %v478_v3 }
 0x1a7   : > { %589 = vmatprep.mubr.bf16.mxu0 %v1386_v30 }
 0x1ae   : > { %1043 = vmatmul.mubr.msk.bf16.gmra.mrb[20].mxu0 %vm482_vm5, %v479_v4 }
 0x1af   : > { %599 = vmatprep.mubr.bf16.mxu0 %v1386_v30 }
 0x1b6   : > { %1044 = vmatmul.mubr.msk.bf16.gmra.mrb[24].mxu0 %vm482_vm5, %v480_v5 }
 0x1b7   : > { %609 = vmatprep.mubr.bf16.mxu0 %v1386_v30 }
 0x1be   : > { %1045 = vmatmul.mubr.msk.bf16.gmra.mrb[28].mxu0 %vm482_vm5, %v481_v6 }
 0x1bf   : > { %844 = vmatprep.mubr.bf16.mxu0 %v1212_v25 }
 0x259   : > { %v1664_v7 = vpop.f32.mrb[0].mxu0 }
 0x25a   : > { %v1666_v8 = vpop.f32.mrb[1].mxu0 }
 0x25b   : > { %v1668_v9 = vpop.f32.mrb[2].mxu0  ;;  %v620_v10 = vmax.f32 %v1664_v7, %v1666_v8 }
 0x25c   : > { %v1672_v11 = vpop.f32.mrb[3].mxu0 }
 0x25d   : > { %621 = vmax.xlane.f32.xlu0 %v620_v10  ;;  %v623_v12 = vmax.f32 %v1668_v9, %v1672_v11 }
 0x25f   : > { %624 = vmax.xlane.f32.xlu1 %v623_v12 }
 0x261   : > { %v1676_v13 = vpop.f32.mrb[4].mxu0 }
 0x262   : > { %v1678_v14 = vpop.f32.mrb[5].mxu0 }
 0x263   : > { %v1680_v15 = vpop.f32.mrb[6].mxu0  ;;  %v626_v16 = vmax.f32 %v1676_v13, %v1678_v14 }
 0x264   : > { %v1684_v17 = vpop.f32.mrb[7].mxu0 }
 0x265   : > { %627 = vmax.xlane.f32.xlu1 %v626_v16  ;;  %v629_v33 = vmax.f32 %v1680_v15, %v1684_v17 }
 0x269   : > { %630 = vmax.xlane.f32.xlu1 %v629_v33  ;;  %v1688_v34 = vpop.f32.mrb[8].mxu0 }
 0x26a   : > { %v1690_v35 = vpop.f32.mrb[9].mxu0 }
 0x26b   : > { %v1692_v36 = vpop.f32.mrb[10].mxu0  ;;  %v632_v37 = vmax.f32 %v1688_v34, %v1690_v35 }
 0x26c   : > { %v1696_v38 = vpop.f32.mrb[11].mxu0 }
 0x26d   : > { %633 = vmax.xlane.f32.xlu1 %v632_v37  ;;  %v635_v39 = vmax.f32 %v1692_v36, %v1696_v38 }
 0x271   : > { %636 = vmax.xlane.f32.xlu1 %v635_v39  ;;  %v1700_v40 = vpop.f32.mrb[12].mxu0 }
 0x272   : > { %v1702_v41 = vpop.f32.mrb[13].mxu0 }
 0x273   : > { %v1704_v42 = vpop.f32.mrb[14].mxu0  ;;  %v638_v43 = vmax.f32 %v1700_v40, %v1702_v41 }
 0x274   : > { %v1708_v44 = vpop.f32.mrb[15].mxu0 }
 0x275   : > { %639 = vmax.xlane.f32.xlu1 %v638_v43  ;;  %v641_v45 = vmax.f32 %v1704_v42, %v1708_v44 }
 0x279   : > { %642 = vmax.xlane.f32.xlu1 %v641_v45  ;;  %v1712_v46 = vpop.f32.mrb[16].mxu0 }
 0x27a   : > { %v1714_v47 = vpop.f32.mrb[17].mxu0 }
 0x27b   : > { %v1716_v48 = vpop.f32.mrb[18].mxu0  ;;  %v644_v49 = vmax.f32 %v1712_v46, %v1714_v47 }
 0x27c   : > { %v1720_v50 = vpop.f32.mrb[19].mxu0 }
 0x27d   : > { %645 = vmax.xlane.f32.xlu1 %v644_v49  ;;  %v647_v51 = vmax.f32 %v1716_v48, %v1720_v50 }
 0x281   : > { %648 = vmax.xlane.f32.xlu1 %v647_v51  ;;  %v1724_v52 = vpop.f32.mrb[20].mxu0 }
 0x282   : > { %v1726_v53 = vpop.f32.mrb[21].mxu0 }
 0x283   : > { %v1728_v54 = vpop.f32.mrb[22].mxu0  ;;  %v650_v55 = vmax.f32 %v1724_v52, %v1726_v53 }
 0x284   : > { %v1732_v56 = vpop.f32.mrb[23].mxu0 }
 0x285   : > { %651 = vmax.xlane.f32.xlu1 %v650_v55  ;;  %v653_v57 = vmax.f32 %v1728_v54, %v1732_v56 }
 0x289   : > { %654 = vmax.xlane.f32.xlu1 %v653_v57  ;;  %v1736_v58 = vpop.f32.mrb[24].mxu0 }
 0x28a   : > { %v1738_v59 = vpop.f32.mrb[25].mxu0 }
 0x28b   : > { %v1740_v60 = vpop.f32.mrb[26].mxu0  ;;  %v656_v61 = vmax.f32 %v1736_v58, %v1738_v59 }
 0x28c   : > { %v1744_v62 = vpop.f32.mrb[27].mxu0 }
 0x28d   : > { %657 = vmax.xlane.f32.xlu1 %v656_v61  ;;  %v659_v63 = vmax.f32 %v1740_v60, %v1744_v62 }
 0x28f   : > { %660 = vmax.xlane.f32.xlu0 %v659_v63 }
 0x291   : > { %v1748_v18 = vpop.f32.mrb[28].mxu0 }
 0x292   : > { %v1750_v19 = vpop.f32.mrb[29].mxu0 }
 0x293   : > { %v1752_v20 = vpop.f32.mrb[30].mxu0  ;;  %v662_v21 = vmax.f32 %v1748_v18, %v1750_v19 }
 0x294   : > { %v1756_v22 = vpop.f32.mrb[31].mxu0 }
 0x295   : > { %663 = vmax.xlane.f32.xlu1 %v662_v21  ;;  %v665_v23 = vmax.f32 %v1752_v20, %v1756_v22 }
 0x297   : > { %666 = vmax.xlane.f32.xlu0 %v665_v23 }
 0x2ea   : > { %v622_v26 = vpop.xlane.xlu0 %621 }
 0x2eb   : > { %v668_v27 = vsub.f32 %v1664_v7, %v622_v26  ;;  %v669_v28 = vsub.f32 %v1666_v8, %v622_v26 }
 0x2ec   : > { %v625_v29 = vpop.xlane.xlu1 %624 }
 0x2ed   : > { %v700_v30 = vmul.f32 1.442695, %v668_v27  ;;  %v702_v31 = vmul.f32 1.442695, %v669_v28  ;;  %v670_v32 = vsub.f32 %v1668_v9, %v625_v29  ;;  %v671_v0 = vsub.f32 %v1672_v11, %v625_v29 }
 0x2ef   : > { %1213 = vpow2.f32 %v700_v30  ;;  %v704_v1 = vmul.f32 1.442695, %v670_v32  ;;  %v706_v2 = vmul.f32 1.442695, %v671_v0 }
 0x2f0   : > { %1215 = vpow2.f32 %v702_v31 }
 0x2f1   : > { %1217 = vpow2.f32 %v704_v1 }
 0x2f2   : > { %1219 = vpow2.f32 %v706_v2  ;;  %v628_v3 = vpop.xlane.xlu1 %627 }
 0x2f3   : > { %v672_v4 = vsub.f32 %v1676_v13, %v628_v3  ;;  %v673_v5 = vsub.f32 %v1678_v14, %v628_v3 }
 0x2f5   : > { %v708_v6 = vmul.f32 1.442695, %v672_v4  ;;  %v710_v7 = vmul.f32 1.442695, %v673_v5 }
 0x2f6   : > { %v631_v8 = vpop.xlane.xlu1 %630 }
 0x2f7   : > { %v674_v10 = vsub.f32 %v1680_v15, %v631_v8  ;;  %v675_v9 = vsub.f32 %v1684_v17, %v631_v8  ;;  %1221 = vpow2.f32 %v708_v6 }
 0x2f8   : > { %1223 = vpow2.f32 %v710_v7 }
 0x2f9   : > { %v1214_v12 = vpop.eup %1213  ;;  %v712_v11 = vmul.f32 1.442695, %v674_v10  ;;  %v714_v16 = vmul.f32 1.442695, %v675_v9 }
 0x2fa   : > { %v1216_v33 = vpop.eup %1215  ;;  %v634_v37 = vpop.xlane.xlu1 %633 }
 0x2fb   : > { %v1218_v39 = vpop.eup %1217  ;;  %1225 = vpow2.f32 %v712_v11  ;;  %v676_v13 = vsub.f32 %v1688_v34, %v634_v37  ;;  %v677_v14 = vsub.f32 %v1690_v35, %v634_v37 }
 0x2fc   : > { %v1220_v43 = vpop.eup %1219  ;;  %1227 = vpow2.f32 %v714_v16  ;;  %v764_v45 = vpack.c.bf16 %v1218_v39, %v1214_v12 }
 0x2fd   : > { %v716_v49 = vmul.f32 1.442695, %v676_v13  ;;  %v765_v15 = vpack.c.bf16 %v1220_v43, %v1216_v33  ;;  %v718_v51 = vmul.f32 1.442695, %v677_v14 }
 0x2fe   : > { %v637_v17 = vpop.xlane.xlu1 %636 }
 0x2ff   : > { %v678_v55 = vsub.f32 %v1692_v36, %v637_v17  ;;  %v679_v57 = vsub.f32 %v1696_v38, %v637_v17  ;;  %812 = vmatprep.subr.bf16.mxu0 %v765_v15  ;;  %1099 = vmatprep.subr.bf16.mxu1 %v765_v15  ;;  %1229 = vpow2.f32 %v716_v49 }
 0x300   : > { %813 = vmatpush1.bf16.xpose.msra.mxu0 %v764_v45  ;;  %1107 = vmatpush1.bf16.xpose.msra.mxu1 %v764_v45  ;;  %1231 = vpow2.f32 %v718_v51 }
 0x301   : > { %v720_v61 = vmul.f32 1.442695, %v678_v55  ;;  %v722_v34 = vmul.f32 1.442695, %v679_v57  ;;  %v1222_v63 = vpop.eup %1221 }
 0x302   : > { %v640_v35 = vpop.xlane.xlu1 %639  ;;  %v1224_v24 = vpop.eup %1223 }
 0x303   : > { %1233 = vpow2.f32 %v720_v61  ;;  %v680_v21 = vsub.f32 %v1700_v40, %v640_v35  ;;  %v681_v23 = vsub.f32 %v1702_v41, %v640_v35 }
 0x304   : > { %1235 = vpow2.f32 %v722_v34 }
 0x305   : > { %v1226_v36 = vpop.eup %1225  ;;  %v724_v25 = vmul.f32 1.442695, %v680_v21  ;;  %v726_v26 = vmul.f32 1.442695, %v681_v23 }
 0x306   : > { %v1228_v38 = vpop.eup %1227  ;;  %v643_v27 = vpop.xlane.xlu1 %642  ;;  %v766_v28 = vpack.c.bf16 %v1226_v36, %v1222_v63 }
 0x307   : > { %v682_v29 = vsub.f32 %v1704_v42, %v643_v27  ;;  %v683_v30 = vsub.f32 %v1708_v44, %v643_v27  ;;  %v767_v31 = vpack.c.bf16 %v1228_v38, %v1224_v24  ;;  %1237 = vpow2.f32 %v724_v25 }
 0x308   : > { %1239 = vpow2.f32 %v726_v26 }
 0x309   : > { %v728_v32 = vmul.f32 1.442695, %v682_v29  ;;  %v730_v0 = vmul.f32 1.442695, %v683_v30  ;;  %814 = vmatprep.subr.bf16.mxu0 %v767_v31  ;;  %1100 = vmatprep.subr.bf16.mxu1 %v767_v31  ;;  %v1230_v41 = vpop.eup %1229 }
 0x30a   : > { %815 = vmatpush1.bf16.xpose.msra.mxu0 %v766_v28  ;;  %1108 = vmatpush1.bf16.xpose.msra.mxu1 %v766_v28  ;;  %v646_v40 = vpop.xlane.xlu1 %645  ;;  %v1232_v3 = vpop.eup %1231 }
 0x30b   : > { %1241 = vpow2.f32 %v728_v32  ;;  %v684_v1 = vsub.f32 %v1712_v46, %v646_v40  ;;  %v685_v2 = vsub.f32 %v1714_v47, %v646_v40 }
 0x30c   : > { %1243 = vpow2.f32 %v730_v0 }
 0x30d   : > { %v1234_v42 = vpop.eup %1233  ;;  %v732_v44 = vmul.f32 1.442695, %v684_v1  ;;  %v734_v5 = vmul.f32 1.442695, %v685_v2 }
 0x30e   : > { %v1236_v4 = vpop.eup %1235  ;;  %v649_v6 = vpop.xlane.xlu1 %648  ;;  %v768_v7 = vpack.c.bf16 %v1234_v42, %v1230_v41 }
 0x30f   : > { %v686_v8 = vsub.f32 %v1716_v48, %v649_v6  ;;  %v687_v10 = vsub.f32 %v1720_v50, %v649_v6  ;;  %v769_v9 = vpack.c.bf16 %v1236_v4, %v1232_v3  ;;  %1245 = vpow2.f32 %v732_v44 }
 0x310   : > { %1247 = vpow2.f32 %v734_v5 }
 0x311   : > { %v736_v12 = vmul.f32 1.442695, %v686_v8  ;;  %v738_v11 = vmul.f32 1.442695, %v687_v10  ;;  %816 = vmatprep.subr.bf16.mxu0 %v769_v9  ;;  %1101 = vmatprep.subr.bf16.mxu1 %v769_v9  ;;  %v1238_v47 = vpop.eup %1237  ;;  %v784_v10 = vld [vmem:[#allocation4 + $0x20] sm:$0x11] }
 0x312   : > { %817 = vmatpush1.bf16.xpose.msra.mxu0 %v768_v7  ;;  %1109 = vmatpush1.bf16.xpose.msra.mxu1 %v768_v7  ;;  %v652_v46 = vpop.xlane.xlu1 %651  ;;  %v1240_v37 = vpop.eup %1239  ;;  %v1205_v9 = vld [vmem:[#allocation4 + $0x10] ss:$8 sps:$4 sm:$0xff]  }
 0x313   : > { %1249 = vpow2.f32 %v736_v12  ;;  %v688_v16 = vsub.f32 %v1724_v52, %v652_v46  ;;  %v689_v33 = vsub.f32 %v1726_v53, %v652_v46  ;;  %v1210_v12 = vld [vmem:[#allocation4] ss:$8 sps:$4 sm:$0xff]   ;;  %v1050_v46 = vcombine.low %v784_v10, %v784_v10 }
 0x314   : > { %1251 = vpow2.f32 %v738_v11  ;;  %v1051_v11 = vcombine.high %v784_v10, %v784_v10 }
 0x315   : > { %v1242_v48 = vpop.eup %1241  ;;  %v740_v50 = vmul.f32 1.442695, %v688_v16  ;;  %v742_v13 = vmul.f32 1.442695, %v689_v33 }
 0x316   : > { %v1244_v39 = vpop.eup %1243  ;;  %v655_v14 = vpop.xlane.xlu1 %654  ;;  %v770_v43 = vpack.c.bf16 %v1242_v48, %v1238_v47 }
 0x317   : > { %v690_v45 = vsub.f32 %v1728_v54, %v655_v14  ;;  %v691_v49 = vsub.f32 %v1732_v56, %v655_v14  ;;  %v771_v15 = vpack.c.bf16 %v1244_v39, %v1240_v37  ;;  %1253 = vpow2.f32 %v740_v50 }
 0x318   : > { %1255 = vpow2.f32 %v742_v13 }
 0x319   : > { %v744_v51 = vmul.f32 1.442695, %v690_v45  ;;  %v746_v17 = vmul.f32 1.442695, %v691_v49  ;;  %818 = vmatprep.subr.bf16.mxu0 %v771_v15  ;;  %1102 = vmatprep.subr.bf16.mxu1 %v771_v15  ;;  %v1246_v53 = vpop.eup %1245  ;;  %v882_v49 = vlaneseq }
 0x31a   : > { %819 = vmatpush1.bf16.xpose.msra.mxu0 %v770_v43  ;;  %1110 = vmatpush1.bf16.xpose.msra.mxu1 %v770_v43  ;;  %v658_v52 = vpop.xlane.xlu1 %657  ;;  %v1248_v61 = vpop.eup %1247 }
 0x31b   : > { %1257 = vpow2.f32 %v744_v51  ;;  %v692_v55 = vsub.f32 %v1736_v58, %v658_v52  ;;  %v693_v57 = vsub.f32 %v1738_v59, %v658_v52  ;;  %v883_v51 = vshrl.u32 %v882_v49, 7  ;;  %v876_v52 = vld [vmem:[%s873_s11 + $0x10] ss:$8 sps:$4 sm:$0xff]  }
 0x31c   : > { %1259 = vpow2.f32 %v746_v17  ;;  %v661_v54 = vpop.xlane.xlu0 %660  ;;  %v870_v17 = vstv %s868_s5  ;;  %s1285_s5 = scalar_lea.vmem %s1284_s7, 1024 }
 0x31d   : > { %v1250_v56 = vpop.eup %1249  ;;  %v748_v34 = vmul.f32 1.442695, %v692_v55  ;;  %v750_v35 = vmul.f32 1.442695, %v693_v57  ;;  %v694_v63 = vsub.f32 %v1740_v60, %v661_v54  ;;  %v695_v21 = vsub.f32 %v1744_v62, %v661_v54  ;;  %v874_v57 = vld [vmem:[%s873_s11] ss:$8 sps:$4 sm:$0xff]   ;;  %p1287_p6 = scmp.lt.s32.totalorder %s1285_s5, %s1279_s28 }
 0x31e   : > { %v1252_v23 = vpop.eup %1251  ;;  %v772_v24 = vpack.c.bf16 %v1250_v56, %v1246_v53  ;;  %v884_v53 = vsub.s32 0, %v883_v51  ;;  %v880_v54 = vunpack.c.l.bf16 %v876_v52  ;;  %v881_v56 = vunpack.c.h.bf16 %v876_v52 }
 0x31f   : > { %1261 = vpow2.f32 %v748_v34  ;;  %v752_v36 = vmul.f32 1.442695, %v694_v63  ;;  %v754_v25 = vmul.f32 1.442695, %v695_v21  ;;  %v773_v38 = vpack.c.bf16 %v1252_v23, %v1248_v61  ;;  %p1288_p7 = por %p1287_p6, %p1286_p5 }
 0x320   : > { %1263 = vpow2.f32 %v750_v35  ;;  %v878_v34 = vunpack.c.l.bf16 %v874_v57  ;;  %v879_v63 = vunpack.c.h.bf16 %v874_v57 }
 0x321   : > { %1265 = vpow2.f32 %v752_v36  ;;  %820 = vmatprep.subr.bf16.mxu0 %v773_v38  ;;  %1103 = vmatprep.subr.bf16.mxu1 %v773_v38  ;;  %v1254_v59 = vpop.eup %1253  ;;  %p1289_p9 = pnand %p1288_p7, %p1282_p4 }
 0x322   : > { %1267 = vpow2.f32 %v754_v25  ;;  %821 = vmatpush1.bf16.xpose.msra.mxu0 %v772_v24  ;;  %1111 = vmatpush1.bf16.xpose.msra.mxu1 %v772_v24  ;;  %v664_v58 = vpop.xlane.xlu1 %663  ;;  %v1256_v62 = vpop.eup %1255 }
 0x323   : > { %v696_v26 = vsub.f32 %v1748_v18, %v664_v58  ;;  %v697_v60 = vsub.f32 %v1750_v19, %v664_v58 }
 0x324   : > { %v667_v27 = vpop.xlane.xlu0 %666 }
 0x325   : > { %v1258_v28 = vpop.eup %1257  ;;  %v756_v29 = vmul.f32 1.442695, %v696_v26  ;;  %v758_v30 = vmul.f32 1.442695, %v697_v60  ;;  %v698_v31 = vsub.f32 %v1752_v20, %v667_v27  ;;  %v699_v32 = vsub.f32 %v1756_v22, %v667_v27 }
 0x326   : > { %v1260_v0 = vpop.eup %1259  ;;  %v774_v40 = vpack.c.bf16 %v1258_v28, %v1254_v59 }
 0x327   : > { %1269 = vpow2.f32 %v756_v29  ;;  %v760_v41 = vmul.f32 1.442695, %v698_v31  ;;  %v762_v1 = vmul.f32 1.442695, %v699_v32  ;;  %v775_v2 = vpack.c.bf16 %v1260_v0, %v1256_v62 }
 0x328   : > { %1271 = vpow2.f32 %v758_v30 }
 0x329   : > { %v1262_v3 = vpop.eup %1261  ;;  %1273 = vpow2.f32 %v760_v41  ;;  %822 = vmatprep.subr.bf16.mxu0 %v775_v2  ;;  %1104 = vmatprep.subr.bf16.mxu1 %v775_v2 }
 0x32a   : > { %v1264_v18 = vpop.eup %1263  ;;  %1275 = vpow2.f32 %v762_v1  ;;  %823 = vmatpush1.bf16.xpose.msra.mxu0 %v774_v40  ;;  %1112 = vmatpush1.bf16.xpose.msra.mxu1 %v774_v40 }
 0x32b   : > { %v1266_v19 = vpop.eup %1265 }
 0x32c   : > { %v1268_v42 = vpop.eup %1267  ;;  %v776_v20 = vpack.c.bf16 %v1266_v19, %v1262_v3 }
 0x32d   : > { %v777_v44 = vpack.c.bf16 %v1268_v42, %v1264_v18 }
 0x32f   : > { %824 = vmatprep.subr.bf16.mxu0 %v777_v44  ;;  %1105 = vmatprep.subr.bf16.mxu1 %v777_v44 }
 0x331   : > { %v1270_v22 = vpop.eup %1269 }
 0x332   : > { %v1272_v4 = vpop.eup %1271  ;;  %825 = vmatpush1.bf16.xpose.msra.mxu0 %v776_v20  ;;  %1113 = vmatpush1.bf16.xpose.msra.mxu1 %v776_v20 }
 0x333   : > { %v1274_v5 = vpop.eup %1273 }
 0x334   : > { %v1276_v6 = vpop.eup %1275  ;;  %v778_v7 = vpack.c.bf16 %v1274_v5, %v1270_v22 }
 0x335   : > { %v779_v8 = vpack.c.bf16 %v1276_v6, %v1272_v4 }
 0x337   : > { %826 = vmatprep.subr.bf16.mxu0 %v779_v8  ;;  %1106 = vmatprep.subr.bf16.mxu1 %v779_v8 }
 0x33a   : > { %827 = vmatpush1.bf16.xpose.msra.mxu0 %v778_v7  ;;  %1114 = vmatpush1.bf16.xpose.msra.mxu1 %v778_v7 }
 0x341   : > { %853 = vmatmul.mubr.bf16.vlgmr.msra.gmra.mrb[0].mxu1 %v1205_v9  ;;  %845 = vmatmul.mubr.bf16.vlgmr.msra.gmra.mrb[32].mxu0 %v1210_v12 }
 0x342   : > { %860 = vmatprep.mubr.bf16.mxu1 %v1051_v11 }
 0x349   : > { %861 = vmatmul.mubr.bf16.gmra.mrb[4].mxu1 %v1050_v46 }
 0x414   : > { %v854_v47 = vpop.f32.mrb[0].mxu1  ;;  %v846_v16 = vpop.f32.mrb[32].mxu0 }
 0x415   : > { %v856_v33 = vpop.f32.mrb[1].mxu1  ;;  %v848_v37 = vpop.f32.mrb[33].mxu0 }
 0x416   : > { %v857_v48 = vpop.f32.mrb[2].mxu1  ;;  %v849_v50 = vpop.f32.mrb[34].mxu0 }
 0x417   : > { %v859_v39 = vpop.f32.mrb[3].mxu1  ;;  %v851_v13 = vpop.f32.mrb[35].mxu0 }
 0x41c   : > { %v862_v14 = vpop.f32.mrb[4].mxu1 }
 0x41d   : > { %1277 = vrcp.f32 %v862_v14  ;;  %v864_v43 = vpop.f32.mrb[5].mxu1 }
 0x41e   : > { %v865_v45 = vpop.f32.mrb[6].mxu1 }
 0x41f   : > { %v866_v15 = vpop.f32.mrb[7].mxu1 }
 0x427   : > { %v1278_v55 = vpop.eup %1277 }
 0x428   : > { %v871_v61 = vmul.f32 %v1278_v55, %v870_v17 }
 0x42a   : > { %v885_v35 = vrot.slane %v871_v61, %v884_v53 }
 0x42c   : > { %v886_v21 = vmul.f32 %v885_v35, %v846_v16  ;;  %v888_v23 = vmul.f32 %v885_v35, %v854_v47  ;;  %v889_v24 = vmul.f32 %v885_v35, %v857_v48  ;;  %v887_v36 = vmul.f32 %v885_v35, %v849_v50 }
 0x42e   : > { %v890_v25 = vadd.f32 %v886_v21, %v878_v34  ;;  %v892_v38 = vadd.f32 %v888_v23, %v880_v54  ;;  %v893_v58 = vadd.f32 %v889_v24, %v881_v56  ;;  %v891_v59 = vadd.f32 %v887_v36, %v879_v63 }
 0x430   : > { %894 = vst [vmem:[%s1500_s16] sm:$0xff] %v890_v25  ;;  %896 = vst [vmem:[%s1500_s16 + $0x10] sm:$0xff] %v892_v38 }
 0x431   : > { %897 = vst [vmem:[%s1500_s16 + $0x18] sm:$0xff] %v893_v58  ;;  %895 = vst [vmem:[%s1500_s16 + $0x8] sm:$0xff] %v891_v59 }
 0x432   : > { %1292 = shalt.err (!%p1289_p9)
}
 0x433   : > { %s1293_s9 = scalar_lea.hbm %s1800_s3, 512  ;;  %s1297_s11 = scalar_lea.hbm %s1866_s4, 2048 }
 0x434   : > { %p1294_p10 = scmp.ne.s32.totalorder %s1800_s3, %s1293_s9  ;;  %p1298_p13 = scmp.lt.u32.totalorder %s1800_s3, %s1866_s4 }
 0x435   : > { %p1299_p0 = scmp.lt.u32.totalorder %s1297_s11, %s1293_s9  ;;  %p1301_p2 = scmp.lt.u32.totalorder %s1293_s9, %s1800_s3 }
 0x436   : > { %p1295_p11 = pnand %p1294_p10, %p1470_p3 }
 0x437   : > { %p1300_p1 = por %p1299_p0, %p1298_p13 }
 0x438   : > { %p1296_p12 = pneg %p1295_p11 }
 0x439   : > { %p1302_p4 = por %p1301_p2, %p1300_p1 }
 0x43b   : > { %p1303_p5 = pnand %p1302_p4, %p1296_p12 }
 0x43d   : > { %1306 = shalt.err (!%p1303_p5)
}
 0x43e   : > { %s1388_s14 = smov 128   ;;  %s1389_s20 = smov 256  }
 0x43f   : > { %s1390_s21 = smov 8  }
 0x440   : > { %1115 = dma.vmem_to_hbm [thread:$0]  (%p1470_p3), %s1802_s15, 512, %s1800_s3, %s1810_s25, %s1388_s14, %s1389_s20, %s1390_s21  }
 0x441 PF: > { %p1121_p6 = scmp.ge.s32.totalorder %s1377_s24, 2  ;;  %s928_s28 = sand.u32 1, %s1349_s17  }
 0x442   : > { %s929_s6 = scalar_lea.sflag [#allocation7], %s928_s28 }
 0x443   : > { %p1118_p7 = pnand %p1121_p6, %p1479_p8 }
 0x445   : > { %1344 = dma.done.wait (!%p1118_p7), %s929_s6, 512  }
 0x446   : > { %1346 = vsyncadd (!%p1118_p7), %s929_s6, 4294966784  ;;  %s18_s24 = sadd.s32 1, %s1377_s24   ;;  %s1869_s17 = smov %s1353_s18 }
 0x447   : > { %p15_p9 = scmp.ge.s32.totalorder %s18_s24, 6   ;;  %s1870_s18 = smov %s1357_s19 }
 0x448   : > { %s1871_s19 = smov %s1488_s8  ;;  %s1872_s20 = smov %s1369_s22 }
 0x449   : > { %s1873_s21 = smov %s1373_s23  ;;  %s1874_s22 = smov %s1877_s26 }
 0x44a   : > { %s1875_s23 = smov %s1881_s27  ;;  %17 = sbr.rel (!%p15_p9) target bundleno = 7 (0x7), region = 99 }
 0x451   :  { %934 = vsyncpa [#allocation7], 1 }
 0x452   :  { %936 = vsyncpa [#allocation7 + $0x1], 1 }

</bundles_post_ra>
